<compile_context>
chip_gen: v5e
topology: v5e:2x2
jax: 0.10.0
libtpu: 0.0.40
codegen_flags: <defaults>
</compile_context>

<pallas_src>
import functools

import jax
import jax.numpy as jnp
from jax.experimental import pallas as pl
from jax.experimental.pallas import tpu as pltpu

_MIB = 1024 * 1024


def _ceil_to(v, m):
    return -(-v // m) * m


def _sublane_granule(itemsize):
    # f32 -> 8 sublanes, bf16/f16 -> 16, int8/fp8 -> 32
    return {4: 8, 2: 16, 1: 32}.get(itemsize, 8)


def _vmem_capacity_bytes():
    try:
        return int(pltpu.get_tpu_info().vmem_capacity_bytes)
    except Exception:
        return 64 * _MIB  # conservative (v7x-sized) fallback


def _conv1x1_kernel(x_ref, w_ref, b_ref, o_ref):
    # x_ref: (b, C_in, T)   w_ref: (C_out, C_in)   b_ref: (C_out, 1)   o_ref: (b, C_out, T)
    w = w_ref[...]
    bias = b_ref[...]
    for i in range(x_ref.shape[0]):  # static, short unroll over images in the block
        acc = jnp.dot(w, x_ref[i], preferred_element_type=jnp.float32)
        o_ref[i] = (acc + bias).astype(o_ref.dtype)


@functools.partial(jax.jit, static_argnames=("tile_hw",))
def conv1x1_pallas(x_nchw, weight, bias, *, tile_hw=None):
    """1x1 conv with bias, matching nn.Conv2d(c_in, c_out, 1, bias=True), NCHW in/out.

    x_nchw: (N, C_in, H, W)
    weight: (C_out, C_in)   (PyTorch conv weight squeezed over the 1x1 kernel dims)
    bias:   (C_out,)
    returns (N, C_out, H, W) in x's dtype.
    """
    N, C_in, H, W = x_nchw.shape
    C_out = weight.shape[0]
    HW = H * W
    out_dtype = x_nchw.dtype

    # Free reshapes (contiguous): no HBM copies, no transposes.
    x = x_nchw.reshape(N, C_in, HW)
    w = weight
    bias2d = bias.astype(jnp.float32).reshape(C_out, 1)

    itemsize = jnp.dtype(x.dtype).itemsize
    out_itemsize = jnp.dtype(out_dtype).itemsize

    # ---- generation-aware budgets (trace-time hardware query) -----------------
    cap = _vmem_capacity_bytes()
    small_vmem = cap < 96 * _MIB       # v7x-like: 64 MiB VMEM, 2 TCs, ~3.2 TB/s HBM
    if small_vmem:
        vmem_budget = 40 * _MIB
        per_step_target = 4 * _MIB     # bytes of x+out moved per grid step
        want_min_steps = 2             # keep both TensorCores busy
    else:
        vmem_budget = 96 * _MIB
        per_step_target = 2 * _MIB
        want_min_steps = 1
    vmem_limit = int(min(vmem_budget + 16 * _MIB, cap - 4 * _MIB))

    # ---- VMEM footprints including sublane padding of the 2nd-to-last dim -----
    g_in = _sublane_granule(itemsize)
    g_out = _sublane_granule(out_itemsize)
    C_in_p = _ceil_to(C_in, g_in)
    C_out_p = _ceil_to(C_out, g_out)
    w_vmem = _ceil_to(C_out, 8) * _ceil_to(C_in, 128) * itemsize
    bias_vmem = _ceil_to(C_out, 8) * 128 * 4
    fixed_vmem = 2 * (w_vmem + bias_vmem)          # resident weight+bias (double-buffered)
    pad_lane_bytes = C_in_p * itemsize + C_out_p * out_itemsize  # per lane, per image, padded

    def step_bytes(bb_, t_):  # logical HBM bytes moved per grid step (x read + out write)
        return bb_ * t_ * (C_in * itemsize + C_out * out_itemsize)

    # ---- spatial tile: lane-dense 128-multiple, sized by bytes-per-step -------
    if HW < 128:
        t = HW                          # full-extent last dim is always legal
    else:
        t_cap = (HW // 128) * 128       # stay within HW; ragged tail handled by cdiv + mask
        if tile_hw is not None:
            t_cap = min(t_cap, max(128, (tile_hw // 128) * 128))
        bytes_per_lane = C_in * itemsize + C_out * out_itemsize
        t_want = _ceil_to(max(1, per_step_target // bytes_per_lane), 128)
        t_fit = max(128, ((vmem_budget - fixed_vmem) // (2 * pad_lane_bytes)) // 128 * 128)
        t = max(128, min(t_want, t_cap, t_fit))

    # ---- batch tile: amortize the ~0.35 us/step overhead for tiny images ------
    b_fit = max(1, (vmem_budget - fixed_vmem) // max(1, 2 * t * pad_lane_bytes))
    b_want = max(1, per_step_target // max(1, step_bytes(1, t)))
    bb = int(min(N, b_fit, b_want, 8))  # cap unroll length
    while bb > 1 and N % bb != 0:       # keep batch blocks exact (no partial leading block)
        bb -= 1

    # ---- multi-TC chips: keep at least `want_min_steps` grid steps ------------
    def n_steps(bb_, t_):
        return pl.cdiv(N, bb_) * pl.cdiv(HW, t_)

    while want_min_steps > 1 and n_steps(bb, t) < want_min_steps and bb > 1:
        bb -= 1
        while bb > 1 and N % bb != 0:
            bb -= 1
    if want_min_steps > 1 and n_steps(bb, t) < want_min_steps and HW >= 256:
        t = min(t, _ceil_to(-(-HW // 2), 128))   # split spatial extent across >= 2 steps

    grid = (pl.cdiv(N, bb), pl.cdiv(HW, t))

    cost = pl.CostEstimate(
        flops=2 * N * HW * C_in * C_out,
        transcendentals=0,
        bytes_accessed=(N * C_in * HW * itemsize
                        + N * C_out * HW * out_itemsize
                        + C_out * C_in * itemsize
                        + C_out * 4),
    )

    out = pl.pallas_call(
        _conv1x1_kernel,
        out_shape=jax.ShapeDtypeStruct((N, C_out, HW), out_dtype),
        grid_spec=pltpu.PrefetchScalarGridSpec(
            num_scalar_prefetch=0,
            grid=grid,
            in_specs=[
                pl.BlockSpec((bb, C_in, t), lambda n, s: (n, 0, s)),
                pl.BlockSpec((C_out, C_in), lambda n, s: (0, 0)),
                pl.BlockSpec((C_out, 1), lambda n, s: (0, 0)),
            ],
            out_specs=pl.BlockSpec((bb, C_out, t), lambda n, s: (n, 0, s)),
        ),
        compiler_params=pltpu.CompilerParams(
            dimension_semantics=("parallel", "parallel"),
            vmem_limit_bytes=vmem_limit),
        cost_estimate=cost,
    )(x, w, bias2d)

    return out.reshape(N, C_out, H, W)


class AuxilaryDetectorPallas:
    """Pallas port of AuxilaryDetector's forward hot path (the LargeConv predictor)."""

    def __init__(self, channel: int, cls_num: int = 2, key=None):
        self.cls_num = cls_num
        c_out = 6 + cls_num
        if key is None:
            key = jax.random.PRNGKey(0)
        kw, kb = jax.random.split(key)
        # Deterministic synthetic parameters (shapes match nn.Conv2d(channel, 6+cls_num, 1)).
        scale = 1.0 / jnp.sqrt(jnp.float32(channel))
        self.weight = (jax.random.uniform(kw, (c_out, channel), jnp.float32) * 2.0 - 1.0) * scale
        self.bias = (jax.random.uniform(kb, (c_out,), jnp.float32) * 2.0 - 1.0) * scale

    def __call__(self, x_nchw, targets=None):
        y = conv1x1_pallas(x_nchw, self.weight, self.bias)
        # TODO(synk): DetectHeadWithWeight not available; loss/box decoding not computable here.
        loss = None
        boxes = y
        return loss, boxes


def _reference_conv1x1(x_nchw, weight, bias):
    # einsum reference for correctness check
    return jnp.einsum("nchw,oc->nohw", x_nchw, weight) + bias[None, :, None, None]


if __name__ == "__main__":
    key = jax.random.PRNGKey(0)
    kx, kp = jax.random.split(key)

    N, C, H, W = 2, 4, 16, 16  # small shapes consistent with the module
    x = jax.random.normal(kx, (N, C, H, W), dtype=jnp.float32)

    model = AuxilaryDetectorPallas(channel=C, cls_num=2, key=kp)
    loss, boxes = model(x)
    boxes = jax.block_until_ready(boxes)

    ref = _reference_conv1x1(x, model.weight, model.bias)
    assert boxes.shape == (N, 8, H, W), boxes.shape
    assert jnp.allclose(boxes, ref, atol=1e-4, rtol=1e-4), "mismatch vs reference"

    print("KERNEL_OK")
</pallas_src>

<mosaic_0001>
module attributes {stable_mosaic.version = 11 : i64} {
  func.func @_conv1x1_kernel(%arg0: i32, %arg1: i32, %arg2: memref<1x4x256xf32, #tpu.memory_space<vmem>>, %arg3: memref<8x4xf32, #tpu.memory_space<vmem>>, %arg4: memref<8x1xf32, #tpu.memory_space<vmem>>, %arg5: memref<1x8x256xf32, #tpu.memory_space<vmem>>) attributes {dimension_semantics = [#tpu.dimension_semantics<parallel>, #tpu.dimension_semantics<parallel>], iteration_bounds = array<i64: 2, 1>, scalar_prefetch = 0 : i64, scratch_operands = 0 : i64, tpu.core_type = #tpu.core_type<tc>, window_params = [{transform_indices = @transform_0, window_bounds = array<i64: 1, 4, 256>}, {pipeline_mode = #tpu.pipeline_mode<synchronous>, transform_indices = @transform_1, window_bounds = array<i64: 8, 4>}, {pipeline_mode = #tpu.pipeline_mode<synchronous>, transform_indices = @transform_2, window_bounds = array<i64: 8, 1>}, {transform_indices = @transform_3, window_bounds = array<i64: 1, 8, 256>}]} {
    %c0 = arith.constant 0 : index
    %c0_0 = arith.constant 0 : index
    %0 = vector.load %arg3[%c0, %c0_0] : memref<8x4xf32, #tpu.memory_space<vmem>>, vector<8x4xf32>
    %c0_1 = arith.constant 0 : index
    %c0_2 = arith.constant 0 : index
    %1 = vector.load %arg4[%c0_1, %c0_2] : memref<8x1xf32, #tpu.memory_space<vmem>>, vector<8x1xf32>
    %c0_3 = arith.constant 0 : index
    %c0_4 = arith.constant 0 : index
    %c0_5 = arith.constant 0 : index
    %2 = vector.load %arg2[%c0_3, %c0_4, %c0_5] : memref<1x4x256xf32, #tpu.memory_space<vmem>>, vector<1x4x256xf32>
    %3 = vector.shape_cast %2 : vector<1x4x256xf32> to vector<4x256xf32>
    %cst = arith.constant dense<0.000000e+00> : vector<8x256xf32>
    %4 = tpu.matmul %0, %3, %cst {dimension_numbers = #tpu.dot_dimension_numbers<[1], [0], [0], [1], [0, 0, 1, 1], [], []>} : vector<8x4xf32>, vector<4x256xf32>, vector<8x256xf32> -> vector<8x256xf32>
    %5 = vector.broadcast %1 : vector<8x1xf32> to vector<8x256xf32>
    %6 = arith.addf %4, %5 : vector<8x256xf32>
    %c0_6 = arith.constant 0 : index
    %c0_7 = arith.constant 0 : index
    %c0_8 = arith.constant 0 : index
    %7 = vector.load %arg5[%c0_6, %c0_7, %c0_8] : memref<1x8x256xf32, #tpu.memory_space<vmem>>, vector<1x8x256xf32>
    %8 = vector.shape_cast %7 : vector<1x8x256xf32> to vector<8x256xf32>
    %9 = vector.shape_cast %6 : vector<8x256xf32> to vector<1x8x256xf32>
    tpu.vector_store %arg5[%c0_6, %c0_7, %c0_8], %9 {strides = array<i32>} : memref<1x8x256xf32, #tpu.memory_space<vmem>>, vector<1x8x256xf32>,
    return
  }
  func.func @transform_0(%arg0: i32, %arg1: i32) -> (i32, i32, i32) {
    %c0_i32 = arith.constant 0 : i32
    %c0_i32_0 = arith.constant 0 : i32
    return %arg0, %c0_i32, %arg1 : i32, i32, i32
  }
  func.func @transform_1(%arg0: i32, %arg1: i32) -> (i32, i32) {
    %c0_i32 = arith.constant 0 : i32
    %c0_i32_0 = arith.constant 0 : i32
    %c0_i32_1 = arith.constant 0 : i32
    return %c0_i32, %c0_i32_0 : i32, i32
  }
  func.func @transform_2(%arg0: i32, %arg1: i32) -> (i32, i32) {
    %c0_i32 = arith.constant 0 : i32
    %c0_i32_0 = arith.constant 0 : i32
    %c0_i32_1 = arith.constant 0 : i32
    return %c0_i32, %c0_i32_0 : i32, i32
  }
  func.func @transform_3(%arg0: i32, %arg1: i32) -> (i32, i32, i32) {
    %c0_i32 = arith.constant 0 : i32
    %c0_i32_0 = arith.constant 0 : i32
    return %arg0, %c0_i32, %arg1 : i32, i32, i32
  }
}

</mosaic_0001>

<bundles_post_ra>
// kernel: conv1x1_pallas.1
= control target key start
LH: loop header
LB: loop body
LE: loop exit
PB: predicated region body
PF: predicated region fallthrough
CT: control target
= control target key end

     0   :  { %s448_s12 = smov 0   ;;  %s450_s13 = smov 0   ;;  %s487_s0 = inlined_call_operand.vmem [shape: f32[2,4,256], index: 0, kind: input, shape index: {}]   ;;  %s488_s1 = inlined_call_operand.vmem [shape: f32[8,4], index: 1, kind: input, shape index: {}]   ;;  %s489_s2 = inlined_call_operand.vmem [shape: f32[8,1], index: 2, kind: input, shape index: {}]   ;;  %s490_s3 = inlined_call_operand.vmem [shape: f32[2,8,256], index: 3, kind: output, shape index: {}]  }
   0x1   :  { %s452_s14 = smov 0  }
   0x2 LB: > { %s25_s15 = sadd.s32 1, %s421_s13  ;;  %p364_p0 = scmp.ge.s32.totalorder %s425_s14, 1  ;;  %s425_s14 = sphi %s452_s14, %s13_s14   ;;  %s421_s13 = sphi %s450_s13, %s492_s13   ;;  %s417_s12 = sphi %s448_s12, %s491_s12  }
   0x3   : > { %p27_p1 = scmp.ge.s32.totalorder %s25_s15, 2  ;;  %p158_p2 = scmp.lt.s32.totalorder %s425_s14, 3 }
   0x5   : > { %s494_s15 = smov (%p27_p1, %s25_s15), 0  ;;  %p159_p3 = pnand %p364_p0, %p158_p2 }
   0x6   : > { %p191_p4 = scmp.lt.s32.totalorder (!%p159_p3), %s417_s12, 1 }
   0x7   : > { %162 = sbr.rel (%p159_p3) target bundleno = 155 (0x9b), region = 32 }
   0xc   : > { %v211_v0 = vld [vmem:[%s489_s2] sm:$0xff]  ;;  %v427_v1 = vmov 0   ;;  %s496_s12 = smov (!%p191_p4, %s417_s12), 1  ;;  %vm226_vm0 = vcmask 1043456   ;;  %vm222_vm1 = vcmask 31744  }
   0xd   : > { %402 = vset.pattern.permute.xlu0 %v427_v1  ;;  %s375_s18 = sshll.u32 %s496_s12, 3  ;;  %v210_v3 = vld [vmem:[%s488_s1] sm:$0xff]  ;;  %s376_s24 = sshll.u32 %s496_s12, 4 }
   0xe   : > { %215 = vperm.xlu0 %402, %v211_v0   ;;  %s198_s21 = scalar_lea.vmem %s487_s0, %s375_s18  ;;  %s208_s27 = scalar_lea.vmem %s490_s3, %s376_s24 }
   0xf   : > { %v212_v2 = vld [vmem:[%s198_s21] sm:$0xff] }
  0x10   : > { %219 = vst [vmem:[#allocation1] ss:$2 sm:$0xff] %v212_v2 }
  0x17   : > { %v220_v4 = vld.sshfl [vmem:[#allocation1] sm:$0xff pattern:$0x75316420]  ;;  %v221_v5 = vld.sshfl [vmem:[#allocation1 + $0x8] sm:$0xff pattern:$0x75316420] }
  0x18   : > { %369 = vmatpush.msk.msra.mxu0 %vm226_vm0, %v220_v4  ;;  %371 = vmatpush.msk.msra.mxu1 %vm226_vm0, %v221_v5 }
  0x19   : > { %370 = vmatmul.msk.f32.vlgmr.msra.gmra.mxu0 %vm222_vm1, %v210_v3  ;;  %372 = vmatmul.msk.f32.vlgmr.msra.gmra.mxu1 %vm222_vm1, %v210_v3 }
  0x80   : > { %v216_v6 = vpop.permute.xlu0 %215 }
  0x96   : > { %v248_v7 = vpop.f32.mrf.mxu0  ;;  %v268_v8 = vpop.f32.mrf.mxu1 }
  0x97   : > { %v249_v9 = vadd.f32 %v248_v7, %v216_v6  ;;  %v269_v10 = vadd.f32 %v268_v8, %v216_v6 }
  0x99   : > { %271 = vst [vmem:[%s208_s27] sm:$0xff] %v249_v9 }
  0x9a   : > { %272 = vst [vmem:[%s208_s27 + $0x8] sm:$0xff] %v269_v10 }
  0x9b PF: > { %s13_s14 = sadd.s32 1, %s425_s14   ;;  %s491_s12 = smov %s421_s13 }
  0x9c   : > { %p10_p5 = scmp.ge.s32.totalorder %s13_s14, 4   ;;  %s492_s13 = smov %s494_s15 }
  0x9e   :  { %12 = sbr.rel (!%p10_p5) target bundleno = 2 (0x2), region = 62 }

</bundles_post_ra>
